<compile_context>
chip_gen: v7x
topology: tpu7x:2x2x1
jax: 0.10.0
libtpu: 0.0.40
codegen_flags: <defaults>
</compile_context>

<pallas_src>
import jax
import jax.numpy as jnp
from jax.experimental import pallas as pl
from jax.experimental.pallas import tpu as pltpu

EPS = 1e-5          # nn.BatchNorm2d default eps
NEG_SLOPE = 0.1     # nn.LeakyReLU(0.1)


# ----------------------------- in-kernel conv -----------------------------
def _conv3x3_rows(slab, wb_ref):
    """3x3 'same' conv of one image plane packed as (H, W*Cin) rows.

    wb_ref: (3, W*Cin, W*Cout) banded weights, one slab per kernel row dh.
    Row r of (slab @ wb[dh]) is the dh-tap contribution of input row r, which
    belongs to output row r - dh + 1; the two sublane shifts below realize the
    vertical taps (with implicit zero padding at the H boundary).
    Returns (H, W*Cout) float32.
    """
    h = slab.shape[0]
    y_top = jnp.dot(slab, wb_ref[0], preferred_element_type=jnp.float32)  # dh = 0
    y_mid = jnp.dot(slab, wb_ref[1], preferred_element_type=jnp.float32)  # dh = 1
    y_bot = jnp.dot(slab, wb_ref[2], preferred_element_type=jnp.float32)  # dh = 2
    zrow = jnp.zeros((1, y_mid.shape[1]), jnp.float32)
    from_above = jnp.concatenate([zrow, y_top[: h - 1, :]], axis=0)  # out[h] += y_top[h-1]
    from_below = jnp.concatenate([y_bot[1:, :], zrow], axis=0)       # out[h] += y_bot[h+1]
    return y_mid + from_above + from_below


# ------------------------------- kernels ----------------------------------
def _stats_kernel(x_ref, wb_ref, s_ref, ss_ref):
    # Accumulate per-(w, c) column sums / sums-of-squares of conv(x) over the grid.
    @pl.when(pl.program_id(0) == 0)
    def _():
        s_ref[...] = jnp.zeros_like(s_ref)
        ss_ref[...] = jnp.zeros_like(ss_ref)

    y = _conv3x3_rows(x_ref[0], wb_ref)
    s_ref[...] += jnp.sum(y, axis=0, keepdims=True)
    ss_ref[...] += jnp.sum(y * y, axis=0, keepdims=True)


def _apply_and_next_stats_kernel(x_ref, wb1_ref, sc1_ref, sh1_ref, wb2_ref,
                                 y1_ref, s2_ref, ss2_ref):
    # y1 = LeakyReLU(BN1(conv1(x))) written out, plus fused BN2 stats of conv2(y1).
    @pl.when(pl.program_id(0) == 0)
    def _():
        s2_ref[...] = jnp.zeros_like(s2_ref)
        ss2_ref[...] = jnp.zeros_like(ss2_ref)

    y = _conv3x3_rows(x_ref[0], wb1_ref)
    z = y * sc1_ref[...] + sh1_ref[...]
    a = jnp.where(z > 0, z, NEG_SLOPE * z)
    y1_ref[0] = a

    c2 = _conv3x3_rows(a, wb2_ref)
    s2_ref[...] += jnp.sum(c2, axis=0, keepdims=True)
    ss2_ref[...] += jnp.sum(c2 * c2, axis=0, keepdims=True)


def _apply_kernel(x_ref, wb_ref, sc_ref, sh_ref, o_ref):
    y = _conv3x3_rows(x_ref[0], wb_ref)
    z = y * sc_ref[...] + sh_ref[...]
    o_ref[0] = jnp.where(z > 0, z, NEG_SLOPE * z)


# --------------------------- pallas_call wrappers --------------------------
def _stats_call(x_p, wb):
    n, h, wci = x_p.shape
    wco = wb.shape[2]
    return pl.pallas_call(
        _stats_kernel,
        grid=(n,),
        in_specs=[
            pl.BlockSpec((1, h, wci), lambda i: (i, 0, 0)),
            pl.BlockSpec((3, wci, wco), lambda i: (0, 0, 0)),
        ],
        out_specs=(
            pl.BlockSpec((1, wco), lambda i: (0, 0)),
            pl.BlockSpec((1, wco), lambda i: (0, 0)),
        ),
        out_shape=(
            jax.ShapeDtypeStruct((1, wco), jnp.float32),
            jax.ShapeDtypeStruct((1, wco), jnp.float32),
        ),
        compiler_params=pltpu.CompilerParams(dimension_semantics=("arbitrary",)),
    )(x_p, wb)


def _apply_and_next_stats_call(x_p, wb1, sc1, sh1, wb2):
    n, h, wci = x_p.shape
    wco1 = wb1.shape[2]
    wco2 = wb2.shape[2]
    return pl.pallas_call(
        _apply_and_next_stats_kernel,
        grid=(n,),
        in_specs=[
            pl.BlockSpec((1, h, wci), lambda i: (i, 0, 0)),
            pl.BlockSpec((3, wci, wco1), lambda i: (0, 0, 0)),
            pl.BlockSpec((1, wco1), lambda i: (0, 0)),
            pl.BlockSpec((1, wco1), lambda i: (0, 0)),
            pl.BlockSpec((3, wco1, wco2), lambda i: (0, 0, 0)),
        ],
        out_specs=(
            pl.BlockSpec((1, h, wco1), lambda i: (i, 0, 0)),
            pl.BlockSpec((1, wco2), lambda i: (0, 0)),
            pl.BlockSpec((1, wco2), lambda i: (0, 0)),
        ),
        out_shape=(
            jax.ShapeDtypeStruct((n, h, wco1), jnp.float32),
            jax.ShapeDtypeStruct((1, wco2), jnp.float32),
            jax.ShapeDtypeStruct((1, wco2), jnp.float32),
        ),
        compiler_params=pltpu.CompilerParams(dimension_semantics=("arbitrary",)),
    )(x_p, wb1, sc1, sh1, wb2)


def _apply_call(x_p, wb, sc, sh):
    n, h, wci = x_p.shape
    wco = wb.shape[2]
    return pl.pallas_call(
        _apply_kernel,
        grid=(n,),
        in_specs=[
            pl.BlockSpec((1, h, wci), lambda i: (i, 0, 0)),
            pl.BlockSpec((3, wci, wco), lambda i: (0, 0, 0)),
            pl.BlockSpec((1, wco), lambda i: (0, 0)),
            pl.BlockSpec((1, wco), lambda i: (0, 0)),
        ],
        out_specs=pl.BlockSpec((1, h, wco), lambda i: (i, 0, 0)),
        out_shape=jax.ShapeDtypeStruct((n, h, wco), jnp.float32),
        compiler_params=pltpu.CompilerParams(dimension_semantics=("parallel",)),
    )(x_p, wb, sc, sh)


# ------------------------------ glue (tiny) --------------------------------
def build_row_banded_weights(w_oihw, width):
    """(Cout, Cin, 3, 3) -> (3, width*Cin, width*Cout).

    wb[dh, u*Cin + ci, w*Cout + co] = weight[co, ci, dh, u - w + 1]  (0 if |u-w| > 1),
    so one matmul of a lanes-packed image row against wb[dh] applies all three
    horizontal taps of kernel row dh, with W zero-padding baked in.
    """
    w_oihw = w_oihw.astype(jnp.float32)
    c_out, c_in = w_oihw.shape[0], w_oihw.shape[1]
    idx = jnp.arange(width)
    dw = jnp.arange(3)
    sel = (idx[None, :, None] == idx[None, None, :] + dw[:, None, None] - 1)
    wb = jnp.einsum("duw,oihd->huiwo", sel.astype(jnp.float32), w_oihw)
    return wb.reshape(3, width * c_in, width * c_out)


def _bn_scale_shift(s_wc, ss_wc, gamma, beta, width, count):
    """Fold BN (training mode, biased var) into per-channel scale/shift, packed to lanes."""
    c = gamma.shape[0]
    s_c = jnp.sum(s_wc.reshape(width, c), axis=0)
    ss_c = jnp.sum(ss_wc.reshape(width, c), axis=0)
    mean = s_c / count
    var = ss_c / count - mean * mean
    scale = gamma * jax.lax.rsqrt(var + EPS)
    shift = beta - mean * scale
    return (jnp.tile(scale, width).reshape(1, width * c),
            jnp.tile(shift, width).reshape(1, width * c))


def unet_conv5_forward(x_nchw, params):
    n, c_in, h, w = x_nchw.shape
    c_out = params["w2"].shape[0]
    count = n * h * w

    # NCHW -> NHWC, lane-packed rows (boundary-layout glue; hot loops stay packed).
    x_p = jnp.transpose(x_nchw, (0, 2, 3, 1)).reshape(n, h, w * c_in)
    wb1 = build_row_banded_weights(params["w1"], w)
    wb2 = build_row_banded_weights(params["w2"], w)

    # Pass 1: BN1 batch statistics of conv1(x).  (conv bias dropped: BN cancels it)
    s1, ss1 = _stats_call(x_p, wb1)
    sc1, sh1 = _bn_scale_shift(s1, ss1, params["g1"], params["be1"], w, count)

    # Pass 2: y1 = LeakyReLU(BN1(conv1(x))), fused with BN2 stats of conv2(y1).
    y1_p, s2, ss2 = _apply_and_next_stats_call(x_p, wb1, sc1, sh1, wb2)
    sc2, sh2 = _bn_scale_shift(s2, ss2, params["g2"], params["be2"], w, count)

    # Pass 3: y2 = LeakyReLU(BN2(conv2(y1))).
    y2_p = _apply_call(y1_p, wb2, sc2, sh2)

    return jnp.transpose(y2_p.reshape(n, h, w, c_out), (0, 3, 1, 2))


# ------------------------- pure-JAX reference -------------------------
def _ref_block(x_nhwc, w_oihw, b, g, be):
    y = jax.lax.conv_general_dilated(
        x_nhwc,
        jnp.transpose(w_oihw, (2, 3, 1, 0)),  # HWIO
        window_strides=(1, 1),
        padding=((1, 1), (1, 1)),
        dimension_numbers=("NHWC", "HWIO", "NHWC"),
    )
    y = y + b
    mean = jnp.mean(y, axis=(0, 1, 2), keepdims=True)
    var = jnp.mean((y - mean) ** 2, axis=(0, 1, 2), keepdims=True)
    z = (y - mean) * jax.lax.rsqrt(var + EPS) * g + be
    return jnp.where(z > 0, z, NEG_SLOPE * z)


def unet_conv5_reference(x_nchw, params):
    x = jnp.transpose(x_nchw, (0, 2, 3, 1))
    y1 = _ref_block(x, params["w1"], params["b1"], params["g1"], params["be1"])
    y2 = _ref_block(y1, params["w2"], params["b2"], params["g2"], params["be2"])
    return jnp.transpose(y2, (0, 3, 1, 2))


if __name__ == "__main__":
    # Shapes consistent with unetConv5(in_size=4, out_size=8, is_batchnorm=True)
    N, C_IN, C_OUT, H, W = 2, 4, 8, 16, 16

    key = jax.random.PRNGKey(0)
    keys = jax.random.split(key, 9)
    params = {
        "w1": jax.random.normal(keys[0], (C_OUT, C_IN, 3, 3), jnp.float32) * 0.1,
        "b1": jax.random.normal(keys[1], (C_OUT,), jnp.float32) * 0.1,
        "g1": 1.0 + 0.1 * jax.random.normal(keys[2], (C_OUT,), jnp.float32),
        "be1": 0.1 * jax.random.normal(keys[3], (C_OUT,), jnp.float32),
        "w2": jax.random.normal(keys[4], (C_OUT, C_OUT, 3, 3), jnp.float32) * 0.1,
        "b2": jax.random.normal(keys[5], (C_OUT,), jnp.float32) * 0.1,
        "g2": 1.0 + 0.1 * jax.random.normal(keys[6], (C_OUT,), jnp.float32),
        "be2": 0.1 * jax.random.normal(keys[7], (C_OUT,), jnp.float32),
    }
    x = jax.random.normal(keys[8], (N, C_IN, H, W), jnp.float32)

    out = jax.block_until_ready(unet_conv5_forward(x, params))
    ref = jax.block_until_ready(unet_conv5_reference(x, params))

    assert out.shape == (N, C_OUT, H, W), out.shape
    err = float(jnp.max(jnp.abs(out - ref)))
    assert jnp.allclose(out, ref, atol=1e-4, rtol=1e-4), err

    print("KERNEL_OK")
</pallas_src>

<mosaic_0001>
module attributes {stable_mosaic.version = 11 : i64} {
  func.func @_stats_kernel(%arg0: i32, %arg1: memref<1x16x64xf32, #tpu.memory_space<vmem>>, %arg2: memref<3x64x128xf32, #tpu.memory_space<vmem>>, %arg3: memref<1x128xf32, #tpu.memory_space<vmem>>, %arg4: memref<1x128xf32, #tpu.memory_space<vmem>>) attributes {dimension_semantics = [#tpu.dimension_semantics<arbitrary>], iteration_bounds = array<i64: 2>, scalar_prefetch = 0 : i64, scratch_operands = 0 : i64, tpu.core_type = #tpu.core_type<tc>, window_params = [{transform_indices = @transform_0, window_bounds = array<i64: 1, 16, 64>}, {pipeline_mode = #tpu.pipeline_mode<synchronous>, transform_indices = @transform_1, window_bounds = array<i64: 3, 64, 128>}, {pipeline_mode = #tpu.pipeline_mode<synchronous>, transform_indices = @transform_2, window_bounds = array<i64: 1, 128>}, {pipeline_mode = #tpu.pipeline_mode<synchronous>, transform_indices = @transform_3, window_bounds = array<i64: 1, 128>}]} {
    %c0_i32 = arith.constant 0 : i32
    %0 = arith.cmpi eq, %arg0, %c0_i32 : i32
    %1 = arith.extui %0 : i1 to i32
    %c0_i32_0 = arith.constant 0 : i32
    %2 = arith.cmpi ne, %1, %c0_i32_0 : i32
    scf.if %2 {
      %cst_23 = arith.constant 0.000000e+00 : f32
      %32 = vector.broadcast %cst_23 : f32 to vector<1x128xf32>
      %c0_24 = arith.constant 0 : index
      %c0_25 = arith.constant 0 : index
      %33 = vector.load %arg3[%c0_24, %c0_25] : memref<1x128xf32, #tpu.memory_space<vmem>>, vector<1x128xf32>
      tpu.vector_store %arg3[%c0_24, %c0_25], %32 {strides = array<i32>} : memref<1x128xf32, #tpu.memory_space<vmem>>, vector<1x128xf32>,
      %cst_26 = arith.constant 0.000000e+00 : f32
      %34 = vector.broadcast %cst_26 : f32 to vector<1x128xf32>
      %c0_27 = arith.constant 0 : index
      %c0_28 = arith.constant 0 : index
      %35 = vector.load %arg4[%c0_27, %c0_28] : memref<1x128xf32, #tpu.memory_space<vmem>>, vector<1x128xf32>
      tpu.vector_store %arg4[%c0_27, %c0_28], %34 {strides = array<i32>} : memref<1x128xf32, #tpu.memory_space<vmem>>, vector<1x128xf32>,
    } else {
    }
    %c0 = arith.constant 0 : index
    %c0_1 = arith.constant 0 : index
    %c0_2 = arith.constant 0 : index
    %3 = vector.load %arg1[%c0, %c0_1, %c0_2] : memref<1x16x64xf32, #tpu.memory_space<vmem>>, vector<1x16x64xf32>
    %4 = vector.shape_cast %3 : vector<1x16x64xf32> to vector<16x64xf32>
    %c0_3 = arith.constant 0 : index
    %c0_4 = arith.constant 0 : index
    %c0_5 = arith.constant 0 : index
    %5 = vector.load %arg2[%c0_3, %c0_4, %c0_5] : memref<3x64x128xf32, #tpu.memory_space<vmem>>, vector<1x64x128xf32>
    %6 = vector.shape_cast %5 : vector<1x64x128xf32> to vector<64x128xf32>
    %cst = arith.constant dense<0.000000e+00> : vector<16x128xf32>
    %7 = tpu.matmul %4, %6, %cst {dimension_numbers = #tpu.dot_dimension_numbers<[1], [0], [0], [1], [0, 0, 1, 1], [], []>} : vector<16x64xf32>, vector<64x128xf32>, vector<16x128xf32> -> vector<16x128xf32>
    %c1 = arith.constant 1 : index
    %c0_6 = arith.constant 0 : index
    %c0_7 = arith.constant 0 : index
    %8 = vector.load %arg2[%c1, %c0_6, %c0_7] : memref<3x64x128xf32, #tpu.memory_space<vmem>>, vector<1x64x128xf32>
    %9 = vector.shape_cast %8 : vector<1x64x128xf32> to vector<64x128xf32>
    %cst_8 = arith.constant dense<0.000000e+00> : vector<16x128xf32>
    %10 = tpu.matmul %4, %9, %cst_8 {dimension_numbers = #tpu.dot_dimension_numbers<[1], [0], [0], [1], [0, 0, 1, 1], [], []>} : vector<16x64xf32>, vector<64x128xf32>, vector<16x128xf32> -> vector<16x128xf32>
    %c2 = arith.constant 2 : index
    %c0_9 = arith.constant 0 : index
    %c0_10 = arith.constant 0 : index
    %11 = vector.load %arg2[%c2, %c0_9, %c0_10] : memref<3x64x128xf32, #tpu.memory_space<vmem>>, vector<1x64x128xf32>
    %12 = vector.shape_cast %11 : vector<1x64x128xf32> to vector<64x128xf32>
    %cst_11 = arith.constant dense<0.000000e+00> : vector<16x128xf32>
    %13 = tpu.matmul %4, %12, %cst_11 {dimension_numbers = #tpu.dot_dimension_numbers<[1], [0], [0], [1], [0, 0, 1, 1], [], []>} : vector<16x64xf32>, vector<64x128xf32>, vector<16x128xf32> -> vector<16x128xf32>
    %cst_12 = arith.constant 0.000000e+00 : f32
    %14 = vector.broadcast %cst_12 : f32 to vector<1x128xf32>
    %15 = vector.extract_strided_slice %7 {offsets = [0, 0], sizes = [15, 128], strides = [1, 1]} : vector<16x128xf32> to vector<15x128xf32>
    %16 = tpu.concatenate %14, %15 in 0 : vector<1x128xf32>, vector<15x128xf32> -> vector<16x128xf32>
    %17 = vector.extract_strided_slice %13 {offsets = [1, 0], sizes = [15, 128], strides = [1, 1]} : vector<16x128xf32> to vector<15x128xf32>
    %18 = tpu.concatenate %17, %14 in 0 : vector<15x128xf32>, vector<1x128xf32> -> vector<16x128xf32>
    %19 = arith.addf %10, %16 : vector<16x128xf32>
    %20 = arith.addf %19, %18 : vector<16x128xf32>
    %c0_13 = arith.constant 0 : index
    %c0_14 = arith.constant 0 : index
    %21 = vector.load %arg3[%c0_13, %c0_14] : memref<1x128xf32, #tpu.memory_space<vmem>>, vector<1x128xf32>
    %cst_15 = arith.constant dense<0.000000e+00> : vector<128xf32>
    %22 = vector.multi_reduction <add>, %20, %cst_15 [0] : vector<16x128xf32> to vector<128xf32>
    %23 = vector.shape_cast %22 : vector<128xf32> to vector<1x128xf32>
    %24 = arith.addf %21, %23 : vector<1x128xf32>
    %c0_16 = arith.constant 0 : index
    %c0_17 = arith.constant 0 : index
    %25 = vector.load %arg3[%c0_16, %c0_17] : memref<1x128xf32, #tpu.memory_space<vmem>>, vector<1x128xf32>
    tpu.vector_store %arg3[%c0_16, %c0_17], %24 {strides = array<i32>} : memref<1x128xf32, #tpu.memory_space<vmem>>, vector<1x128xf32>,
    %c0_18 = arith.constant 0 : index
    %c0_19 = arith.constant 0 : index
    %26 = vector.load %arg4[%c0_18, %c0_19] : memref<1x128xf32, #tpu.memory_space<vmem>>, vector<1x128xf32>
    %27 = arith.mulf %20, %20 : vector<16x128xf32>
    %cst_20 = arith.constant dense<0.000000e+00> : vector<128xf32>
    %28 = vector.multi_reduction <add>, %27, %cst_20 [0] : vector<16x128xf32> to vector<128xf32>
    %29 = vector.shape_cast %28 : vector<128xf32> to vector<1x128xf32>
    %30 = arith.addf %26, %29 : vector<1x128xf32>
    %c0_21 = arith.constant 0 : index
    %c0_22 = arith.constant 0 : index
    %31 = vector.load %arg4[%c0_21, %c0_22] : memref<1x128xf32, #tpu.memory_space<vmem>>, vector<1x128xf32>
    tpu.vector_store %arg4[%c0_21, %c0_22], %30 {strides = array<i32>} : memref<1x128xf32, #tpu.memory_space<vmem>>, vector<1x128xf32>,
    return
  }
  func.func @transform_0(%arg0: i32) -> (i32, i32, i32) {
    %c0_i32 = arith.constant 0 : i32
    %c0_i32_0 = arith.constant 0 : i32
    %c0_i32_1 = arith.constant 0 : i32
    return %arg0, %c0_i32, %c0_i32_0 : i32, i32, i32
  }
  func.func @transform_1(%arg0: i32) -> (i32, i32, i32) {
    %c0_i32 = arith.constant 0 : i32
    %c0_i32_0 = arith.constant 0 : i32
    %c0_i32_1 = arith.constant 0 : i32
    %c0_i32_2 = arith.constant 0 : i32
    return %c0_i32, %c0_i32_0, %c0_i32_1 : i32, i32, i32
  }
  func.func @transform_2(%arg0: i32) -> (i32, i32) {
    %c0_i32 = arith.constant 0 : i32
    %c0_i32_0 = arith.constant 0 : i32
    %c0_i32_1 = arith.constant 0 : i32
    return %c0_i32, %c0_i32_0 : i32, i32
  }
  func.func @transform_3(%arg0: i32) -> (i32, i32) {
    %c0_i32 = arith.constant 0 : i32
    %c0_i32_0 = arith.constant 0 : i32
    %c0_i32_1 = arith.constant 0 : i32
    return %c0_i32, %c0_i32_0 : i32, i32
  }
}

</mosaic_0001>

<bundles_post_ra>
// kernel: tpu_custom_call.1
= control target key start
LH: loop header
LB: loop body
LE: loop exit
PB: predicated region body
PF: predicated region fallthrough
CT: control target
= control target key end

     0   :  { %9 = vsyncpa [#allocation3], 0  ;;  %s1211_s0 = inlined_call_operand.hbm [shape: f32[2,16,64], index: 0, kind: input, shape index: {}]   ;;  %s1212_s1 = inlined_call_operand.hbm [shape: f32[3,64,128], index: 1, kind: input, shape index: {}]   ;;  %s1213_s2 = inlined_call_operand.hbm [shape: f32[1,128], index: 2, kind: output, shape index: {0}]   ;;  %s1214_s3 = inlined_call_operand.hbm [shape: f32[1,128], index: 3, kind: output, shape index: {1}]  }
   0x1   :  { %11 = vsyncpa [#allocation3 + $0x1], 0 }
   0x2   :  { %12 = vsyncpa [#allocation6], 0 }
   0x3   :  { %13 = vsyncpa [#allocation4], 0 }
   0x4   :  { %14 = vsyncpa [#allocation9], 0  ;;  %s999_s12 = smov 0   ;;  %s1001_s13 = smov 0  }
   0x5   :  { %s1003_s14 = smov 0   ;;  %s1005_s15 = smov 0  }
   0x6 LB: > { %s1018_s16 = sadd.s32 4294967295, %s970_s15   ;;  %p40_p0 = scmp.ne.s32.totalorder %s962_s13, %s958_s12  ;;  %s970_s15 = sphi %s1005_s15, %s1230_s15   ;;  %s966_s14 = sphi %s1003_s14, %s1229_s14   ;;  %s962_s13 = sphi %s1001_s13, %s1228_s13   ;;  %s958_s12 = sphi %s999_s12, %s1227_s12  }
   0x7   : > { %p1215_p1 = scmp.eq.s32.totalorder %s1018_s16, 0  ;;  %p589_p2 = scmp.ge.s32.totalorder %s970_s15, 1 }
   0x8   : > { %p114_p3 = scmp.lt.s32.totalorder %s970_s15, 3  ;;  %s972_s19 = smov [#allocation5]  }
   0x9   : > { %p1027_p5 = por %p1215_p1, %p40_p0  ;;  %s126_s20 = sshll.u32 %s972_s19, 4  ;;  %s127_s20 = int_to_ptr.vmem [resolvable:$true] %s126_s20 }
   0xa   : > { %p1031_p6 = pnand %p589_p2, %p114_p3  ;;  %s1044_s22 = sadd.s32 1, %s970_s15  }
   0xb   : > { %s1218_s17 = scalar_select %p1027_p5, 1, 0 }
   0xc   : > { %s1219_s18 = scalar_select %p1031_p6, 1, 0 }
   0xd   : > { %p761_p7 = pneg %p1031_p6  ;;  %s27_s23 = sadd.s32 1, %s966_s14 }
   0xe   : > { %s24_s24 = ssub.s32 %s970_s15, %s1044_s22  ;;  %s814_s27 = scalar_lea.hbm %s1212_s1, 3072 }
   0xf   : > { %p1039_p8 = pnand %p761_p7, %p1215_p1  ;;  %p815_p9 = scmp.ne.s32.totalorder %s1212_s1, %s814_s27 }
  0x10   : > { %p821_p13 = scmp.lt.u32.totalorder %s814_s27, %s1212_s1 }
  0x11   : > { %p816_p10 = pneg %p1039_p8 }
  0x13   : > { %p817_p11 = pnand %p816_p10, %p815_p9 }
  0x15   : > { %p818_p12 = pneg %p817_p11 }
  0x17   : > { %p823_p0 = pnand %p821_p13, %p818_p12 }
  0x19   : > { %826 = shalt.err (!%p823_p0)
}
  0x1a   : > { %s827_s5 = scalar_lea.vmem %s127_s20, 3072  ;;  %p835_p4 = scmp.lt.s32.totalorder %s127_s20, %s127_s20 }
  0x1b   : > { %p828_p2 = scmp.ne.s32.totalorder %s127_s20, %s827_s5  ;;  %p836_p1 = scmp.lt.s32.totalorder %s827_s5, %s827_s5 }
  0x1d   : > { %p830_p3 = pnand %p828_p2, %p816_p10  ;;  %p837_p5 = por %p836_p1, %p835_p4 }
  0x1f   : > { %p831_p7 = pneg %p830_p3 }
  0x21   : > { %p838_p6 = pnand %p837_p5, %p831_p7 }
  0x23   : > { %841 = shalt.err (!%p838_p6)
}
  0x24   : > { %s973_s6 = smov 128   ;;  %s974_s7 = smov 8  }
  0x25   : > { %764 = dma.hbm_to_vmem [thread:$0]  (!%p1039_p8), %s1212_s1, 3072, %s127_s20, [#allocation6], %s973_s6, %s973_s6, %s974_s7  }
  0x26   : > { %p25_p1 = scmp.eq.s32.totalorder %s24_s24, 0  ;;  %p34_p4 = scmp.ne.s32.totalorder %s966_s14, %s962_s13 }
  0x27   : > { %p35_p5 = scmp.eq.s32.totalorder %s970_s15, 0  ;;  %p770_p6 = scmp.lt.s32.totalorder %s970_s15, 2 }
  0x28   : > { %s1073_s10 = scalar_select %p25_p1, %s966_s14, %s27_s23  }
  0x29   : > { %p36_p9 = por %p35_p5, %p34_p4  ;;  %s140_s11 = sand.u32 1, %s966_s14  }
  0x2a   : > { %s592_s12 = sshll.u32 %s140_s11, 4  ;;  %s611_s19 = sshll.u32 %s970_s15, 8 }
  0x2b   : > { %s1080_s21 = scalar_lea.hbm %s1211_s0, %s611_s19  ;;  %s144_s20 = scalar_lea.vmem [#allocation2], %s592_s12 }
  0x2c   : > { %s151_s24 = sshll.u32 %s144_s20, 4  ;;  %p1084_p8 = pnand %p770_p6, %p36_p9  ;;  %s1082_s24 = int_to_ptr.vmem [resolvable:$true] %s151_s24 }
  0x2d   : > { %s1088_s15 = scalar_lea.sflag [#allocation3], %s140_s11  ;;  %s842_s27 = scalar_lea.hbm %s1080_s21, 256 }
  0x2e   : > { %p843_p10 = scmp.ne.s32.totalorder %s1080_s21, %s842_s27  ;;  %p844_p11 = pneg %p1084_p8 }
  0x2f   : > { %s847_s30 = scalar_lea.hbm %s1211_s0, 512  ;;  %p848_p0 = scmp.lt.u32.totalorder %s1080_s21, %s1211_s0 }
  0x30   : > { %p845_p12 = pnand %p844_p11, %p843_p10  ;;  %p849_p2 = scmp.lt.u32.totalorder %s847_s30, %s842_s27 }
  0x31   : > { %p851_p7 = scmp.lt.u32.totalorder %s842_s27, %s1080_s21 }
  0x32   : > { %p846_p13 = pneg %p845_p12  ;;  %p850_p3 = por %p849_p2, %p848_p0 }
  0x34   : > { %p852_p1 = por %p851_p7, %p850_p3 }
  0x36   : > { %p853_p4 = pnand %p852_p1, %p846_p13 }
  0x38   : > { %856 = shalt.err (!%p853_p4)
}
  0x39   : > { %s857_s8 = scalar_lea.vmem %s1082_s24, 256  ;;  %s975_s9 = smov [#allocation2]  }
  0x3a   : > { %p858_p5 = scmp.ne.s32.totalorder %s1082_s24, %s857_s8  ;;  %s862_s11 = sshll.u32 %s975_s9, 4  ;;  %s863_s11 = int_to_ptr.vmem [resolvable:$false] %s862_s11 }
  0x3b   : > { %s864_s12 = scalar_lea.vmem %s863_s11, 512  ;;  %p865_p10 = scmp.lt.s32.totalorder %s1082_s24, %s863_s11 }
  0x3c   : > { %p860_p6 = pnand %p858_p5, %p844_p11  ;;  %p866_p12 = scmp.lt.s32.totalorder %s864_s12, %s857_s8 }
  0x3e   : > { %p861_p9 = pneg %p860_p6  ;;  %p867_p0 = por %p866_p12, %p865_p10 }
  0x40   : > { %p868_p2 = pnand %p867_p0, %p861_p9 }
  0x42   : > { %871 = shalt.err (!%p868_p2)
}
  0x43   : > { %768 = dma.hbm_to_vmem [thread:$0]  (!%p1084_p8), %s1080_s21, 256, %s1082_s24, %s1088_s15, %s973_s6, %s973_s6, %s974_s7  }
  0x44   : > { %p1222_p11 = scmp.ne.s32.totalorder %s1219_s18, 0 }
  0x45   : > { %s165_s19 = sand.u32 (!%p1222_p11), 1, %s962_s13   ;;  %p1223_p13 = scmp.ne.s32.totalorder (!%p1222_p11), %s1218_s17, 0 }
  0x46   : > { %163 = sbr.rel (%p1222_p11) target bundleno = 396 (0x18c), region = 28  ;;  %s1122_s25 = sshll.u32 (!%p1222_p11), %s165_s19, 4 }
  0x47   : > { %s166_s26 = scalar_lea.sflag (!%p1222_p11), [#allocation3], %s165_s19  ;;  %s169_s20 = scalar_lea.vmem (!%p1222_p11), [#allocation2], %s1122_s25 }
  0x4d   : > { %941 = dma.done.wait (%p1223_p13), %s166_s26, 256  }
  0x4e   : > { %943 = vsyncadd (%p1223_p13), %s166_s26, 4294967040  ;;  %p1224_p3 = scmp.eq.s32.totalorder %s1018_s16, 0 }
  0x50   : > { %945 = dma.done.wait (%p1224_p3), [#allocation6], 3072   ;;  %p1225_p8 = pmov %p1224_p3 }
  0x51   : > { %p1226_p7 = scmp.ne.s32.totalorder %s1018_s16, 0 }
  0x52   : > { %947 = vsyncadd (%p1225_p8), [#allocation6], 4294964224  ;;  %v976_v0 = vmov (!%p1226_p7), 0.0  }
  0x53   : > { %194 = sbr.rel (%p1226_p7) target bundleno = 90 (0x5a), region = 40  ;;  %195 = vst [vmem:[#allocation7] sm:$0x1] (!%p1226_p7), %v976_v0  ;;  %196 = vst [vmem:[#allocation8] sm:$0x1] (!%p1226_p7), %v976_v0 }
  0x5a PF: > { %v199_v1 = vld [vmem:[#allocation5] sm:$0xff]  ;;  %v200_v2 = vld [vmem:[#allocation5 + $0x8] sm:$0xff]  ;;  %v201_v3 = vld [vmem:[#allocation5 + $0x10] sm:$0xff]  ;;  %vm207_vm0 = vcmask 523264   ;;  %vm384_vm1 = vcmask 1040384   ;;  %vm393_vm2 = vcmask 1046528  }
  0x5b   : > { %v699_v4 = vpack.c.bf16 %v200_v2, %v199_v1  ;;  %v202_v5 = vld [vmem:[#allocation5 + $0x18] sm:$0xff]  ;;  %v203_v7 = vld [vmem:[#allocation5 + $0x20] sm:$0xff]  ;;  %v204_v8 = vld [vmem:[#allocation5 + $0x28] sm:$0xff]  ;;  %s977_s17 = smov [#allocation7]   ;;  %p772_p1 = scmp.eq.s32.totalorder %s1018_s16, 1 }
  0x5c   : > { %v703_v6 = vpack.c.bf16 %v202_v5, %v201_v3  ;;  %v299_v9 = vld [vmem:[#allocation5 + $0x80] sm:$0xff]  ;;  %v300_v10 = vld [vmem:[#allocation5 + $0x88] sm:$0xff]  ;;  %v301_v13 = vld [vmem:[#allocation5 + $0x90] sm:$0xff]  ;;  %v707_v14 = vpack.c.bf16 %v204_v8, %v203_v7  ;;  %s506_s18 = sshll.u32 %s977_s17, 4  ;;  %s978_s6 = smov [#allocation8]   ;;  %s507_s18 = int_to_ptr.vmem [resolvable:$true] %s506_s18 }
  0x5d   : > { %700 = vmatprep.subr.bf16.mxu0 %v699_v4  ;;  %v197_v11 = vld [vmem:[%s169_s20] sm:$0xff]  ;;  %v715_v12 = vpack.c.bf16 %v300_v10, %v299_v9  ;;  %v302_v16 = vld [vmem:[#allocation5 + $0x98] sm:$0xff]  ;;  %v304_v20 = vld [vmem:[#allocation5 + $0xa8] sm:$0xff]  ;;  %s517_s7 = sshll.u32 %s978_s6, 4  ;;  %s872_s21 = scalar_lea.vmem %s507_s18, 16  ;;  %s1146_s7 = int_to_ptr.vmem [resolvable:$true] %s517_s7 }
  0x5e   : > { %702 = vmatpush3.bf16.msra.mxu0 %v699_v4  ;;  %658 = vmatprep.mubr.msk.f32.mxu0 %vm207_vm0, %v197_v11  ;;  %v205_v15 = vld [vmem:[#allocation5 + $0x30] sm:$0xff]  ;;  %v206_v17 = vld [vmem:[#allocation5 + $0x38] sm:$0xff]  ;;  %v719_v18 = vpack.c.bf16 %v302_v16, %v301_v13  ;;  %v303_v19 = vld [vmem:[#allocation5 + $0xa0] sm:$0xff]  ;;  %p873_p4 = scmp.ne.s32.totalorder %s507_s18, %s872_s21  ;;  %s878_s24 = scalar_lea.vmem %s507_s18, 32 }
  0x5f   : > { %704 = vmatprep.subr.bf16.mxu0 %v703_v6  ;;  %677 = vmatprep.mubr.msk.f32.mxu1 %vm207_vm0, %v197_v11  ;;  %v723_v21 = vpack.c.bf16 %v304_v20, %v303_v19  ;;  %v711_v22 = vpack.c.bf16 %v206_v17, %v205_v15  ;;  %v305_v23 = vld [vmem:[#allocation5 + $0xb0] sm:$0xff]  ;;  %v306_v24 = vld [vmem:[#allocation5 + $0xb8] sm:$0xff]  ;;  %v290_v25 = vld [vmem:[#allocation5 + $0x40] sm:$0xff]  ;;  %p879_p9 = scmp.lt.s32.totalorder %s507_s18, %s507_s18  ;;  %p880_p10 = scmp.lt.s32.totalorder %s878_s24, %s872_s21 }
  0x60   : > { %716 = vmatprep.subr.bf16.mxu1 %v715_v12  ;;  %v291_v26 = vld [vmem:[#allocation5 + $0x48] sm:$0xff]  ;;  %v727_v27 = vpack.c.bf16 %v306_v24, %v305_v23  ;;  %v292_v29 = vld [vmem:[#allocation5 + $0x50] sm:$0xff]  ;;  %v293_v30 = vld [vmem:[#allocation5 + $0x58] sm:$0xff]  ;;  %p874_p5 = pnand %p873_p4, %p772_p1 }
  0x61   : > { %718 = vmatpush3.bf16.msra.mxu1 %v715_v12  ;;  %v731_v28 = vpack.c.bf16 %v291_v26, %v290_v25  ;;  %v198_v31 = vld [vmem:[%s169_s20 + $0x8] sm:$0xff]  ;;  %v735_v32 = vpack.c.bf16 %v293_v30, %v292_v29  ;;  %v294_v33 = vld [vmem:[#allocation5 + $0x60] sm:$0xff]  ;;  %v296_v36 = vld [vmem:[#allocation5 + $0x70] sm:$0xff]  ;;  %p881_p12 = por %p880_p10, %p879_p9 }
  0x62   : > { %706 = vmatpush3.bf16.msra.mxu0 %v703_v6  ;;  %720 = vmatprep.subr.bf16.mxu1 %v719_v18  ;;  %v295_v34 = vld [vmem:[#allocation5 + $0x68] sm:$0xff]  ;;  %v297_v37 = vld [vmem:[#allocation5 + $0x78] sm:$0xff]  ;;  %v477_v6 = vld [vmem:[#allocation7] sm:$0x1]  ;;  %p875_p6 = pneg %p874_p5 }
  0x63   : > { %708 = vmatprep.subr.bf16.mxu0 %v707_v14  ;;  %v739_v35 = vpack.c.bf16 %v295_v34, %v294_v33  ;;  %v743_v38 = vpack.c.bf16 %v297_v37, %v296_v36  ;;  %v487_v9 = vld [vmem:[#allocation8] sm:$0x1] }
  0x64   : > { %p882_p0 = pnand %p881_p12, %p875_p6 }
  0x65   : > { %722 = vmatpush3.bf16.msra.mxu1 %v719_v18 }
  0x66   : > { %710 = vmatpush3.bf16.msra.mxu0 %v707_v14  ;;  %724 = vmatprep.subr.bf16.mxu1 %v723_v21 }
  0x67   : > { %712 = vmatprep.subr.bf16.mxu0 %v711_v22 }
  0x69   : > { %726 = vmatpush3.bf16.msra.mxu1 %v723_v21 }
  0x6a   : > { %714 = vmatpush3.bf16.msra.mxu0 %v711_v22  ;;  %728 = vmatprep.subr.bf16.mxu1 %v727_v27 }
  0x6b   : > { %732 = vmatprep.subr.bf16.mxu0 %v731_v28 }
  0x6d   : > { %659 = vmatmul.mubr.msk.f32.vlgmr.msra.gmra.mrb[0].mxu0 %vm207_vm0, %v198_v31  ;;  %730 = vmatpush3.bf16.msra.mxu1 %v727_v27 }
  0x6e   : > { %734 = vmatpush3.bf16.msra.mxu0 %v731_v28  ;;  %696 = vmatprep.mubr.msk.f32.mxu0 %vm207_vm0, %v197_v11 }
  0x6f   : > { %736 = vmatprep.subr.bf16.mxu0 %v735_v32 }
  0x70   : > { %678 = vmatmul.mubr.msk.f32.vlgmr.msra.gmra.mrb[0].mxu1 %vm207_vm0, %v198_v31 }
  0x72   : > { %738 = vmatpush3.bf16.msra.mxu0 %v735_v32 }
  0x73   : > { %740 = vmatprep.subr.bf16.mxu0 %v739_v35 }
  0x76   : > { %742 = vmatpush3.bf16.msra.mxu0 %v739_v35 }
  0x77   : > { %744 = vmatprep.subr.bf16.mxu0 %v743_v38 }
  0x7a   : > { %746 = vmatpush3.bf16.msra.mxu0 %v743_v38 }
  0x7d   : > { %697 = vmatmul.mubr.msk.f32.vlgmr.msra.gmra.mrb[2].mxu0 %vm207_vm0, %v198_v31 }
 0x140   : > { %v660_v39 = vpop.f32.mrb[0].mxu0 }
 0x141   : > { %v386_v40 = vrot.slane %v660_v39, 7  ;;  %v280_v41 = vpop.f32.mrb[1].mxu0 }
 0x142   : > { %v385_v42 = vrot.slane %v280_v41, 7 }
 0x143   : > { %v679_v43 = vpop.f32.mrb[0].mxu1 }
 0x144   : > { %v395_v44 = vrot.slane %v679_v43, 1  ;;  %v373_v45 = vpop.f32.mrb[1].mxu1  ;;  %v387_v46 = vsel %vm384_vm1, %v385_v42, %v386_v40  ;;  %v390_v52 = vsel %vm384_vm1, 0.0, %v385_v42 }
 0x145   : > { %v394_v47 = vrot.slane %v373_v45, 1 }
 0x146   : > { %v399_v49 = vsel %vm393_vm2, %v395_v44, 0.0 }
 0x147   : > { %v396_v48 = vsel %vm393_vm2, %v394_v47, %v395_v44 }
 0x150   : > { %v698_v50 = vpop.f32.mrb[2].mxu0 }
 0x151   : > { %v472_v51 = vadd.f32 %v698_v50, %v387_v46  ;;  %v466_v53 = vpop.f32.mrb[3].mxu0 }
 0x152   : > { %v467_v54 = vadd.f32 %v466_v53, %v390_v52 }
 0x153   : > { %v476_v55 = vadd.f32 %v472_v51, %v399_v49 }
 0x154   : > { %v475_v56 = vadd.f32 %v467_v54, %v396_v48 }
 0x155   : > { %v489_v57 = vmul.f32 %v476_v55, %v476_v55 }
 0x156   : > { %v478_v58 = vadd.f32 %v476_v55, %v475_v56  ;;  %v488_v59 = vmul.f32 %v475_v56, %v475_v56 }
 0x158   : > { %v479_v60 = vrot.slane %v478_v58, 4  ;;  %v490_v61 = vadd.f32 %v489_v57, %v488_v59 }
 0x15a   : > { %v480_v62 = vadd.f32 %v479_v60, %v478_v58  ;;  %v491_v63 = vrot.slane %v490_v61, 4 }
 0x15c   : > { %v481_v0 = vrot.slane %v480_v62, 2  ;;  %v492_v1 = vadd.f32 %v491_v63, %v490_v61 }
 0x15e   : > { %v482_v2 = vadd.f32 %v481_v0, %v480_v62  ;;  %v493_v3 = vrot.slane %v492_v1, 2 }
 0x160   : > { %v483_v4 = vrot.slane %v482_v2, 1  ;;  %v494_v5 = vadd.f32 %v493_v3, %v492_v1 }
 0x162   : > { %v484_v7 = vadd.f32 %v483_v4, %v482_v2  ;;  %v495_v8 = vrot.slane %v494_v5, 1 }
 0x164   : > { %v485_v10 = vadd.f32 %v484_v7, %v477_v6  ;;  %v496_v11 = vadd.f32 %v495_v8, %v494_v5 }
 0x166   : > { %486 = vst [vmem:[#allocation7] sm:$0x1] %v485_v10  ;;  %v497_v12 = vadd.f32 %v496_v11, %v487_v9 }
 0x167   : > { %885 = shalt.err (!%p882_p0)
}
 0x168   : > { %s886_s27 = scalar_lea.hbm %s1213_s2, 16 }
 0x169   : > { %p887_p2 = scmp.ne.s32.totalorder %s1213_s2, %s886_s27  ;;  %p892_p3 = scmp.lt.u32.totalorder %s886_s27, %s1213_s2 }
 0x16b   : > { %p888_p11 = pnand %p887_p2, %p772_p1 }
 0x16d   : > { %p889_p13 = pneg %p888_p11 }
 0x16f   : > { %p894_p8 = pnand %p892_p3, %p889_p13 }
 0x171   : > { %897 = shalt.err (!%p894_p8)
}
 0x172   : > { %754 = dma.vmem_to_hbm [thread:$0]  (%p772_p1), %s507_s18, 16, %s1213_s2, [#allocation4]   ;;  %498 = vst [vmem:[#allocation8] sm:$0x1] %v497_v12 }
 0x173   : > { %s898_s9 = scalar_lea.vmem %s1146_s7, 16  ;;  %s904_s11 = scalar_lea.vmem %s1146_s7, 32 }
 0x174   : > { %p899_p7 = scmp.ne.s32.totalorder %s1146_s7, %s898_s9  ;;  %p905_p6 = scmp.lt.s32.totalorder %s1146_s7, %s1146_s7 }
 0x175   : > { %p906_p9 = scmp.lt.s32.totalorder %s904_s11, %s898_s9 }
 0x176   : > { %p900_p4 = pnand %p899_p7, %p772_p1 }
 0x177   : > { %p907_p10 = por %p906_p9, %p905_p6 }
 0x178   : > { %p901_p5 = pneg %p900_p4 }
 0x17a   : > { %p908_p12 = pnand %p907_p10, %p901_p5 }
 0x17c   : > { %911 = shalt.err (!%p908_p12)
}
 0x17d   : > { %s912_s25 = scalar_lea.hbm %s1214_s3, 16 }
 0x17e   : > { %p913_p0 = scmp.ne.s32.totalorder %s1214_s3, %s912_s25  ;;  %p918_p13 = scmp.lt.u32.totalorder %s912_s25, %s1214_s3 }
 0x180   : > { %p914_p2 = pnand %p913_p0, %p772_p1 }
 0x182   : > { %p915_p11 = pneg %p914_p2 }
 0x184   : > { %p920_p3 = pnand %p918_p13, %p915_p11 }
 0x186   : > { %923 = shalt.err (!%p920_p3)
}
 0x187   : > { %756 = dma.vmem_to_hbm [thread:$0]  (%p772_p1), %s1146_s7, 16, %s1214_s3, [#allocation9]  }
 0x188   : > { %949 = dma.done.wait (%p772_p1), [#allocation4], 16  }
 0x189   : > { %951 = vsyncadd (%p772_p1), [#allocation4], 4294967280 }
 0x18a   : > { %953 = dma.done.wait (%p772_p1), [#allocation9], 16  }
 0x18b   : > { %955 = vsyncadd (%p772_p1), [#allocation9], 4294967280 }
 0x18c PF: > { %p17_p8 = scmp.ge.s32.totalorder %s1044_s22, 4   ;;  %s1227_s12 = smov %s962_s13 }
 0x18d   : > { %s1228_s13 = smov %s966_s14  ;;  %s1229_s14 = smov %s1073_s10 }
 0x18e   : > { %s1230_s15 = smov %s1044_s22  ;;  %19 = sbr.rel (!%p17_p8) target bundleno = 6 (0x6), region = 83 }
 0x195   :  { %534 = vsyncpa [#allocation3], 1 }
 0x196   :  { %536 = vsyncpa [#allocation3 + $0x1], 1 }
 0x197   :  { %537 = vsyncpa [#allocation6], 1 }
 0x198   :  { %538 = vsyncpa [#allocation4], 1 }
 0x199   :  { %540 = vsyncpa [#allocation4 + $0x1], 1 }
 0x19a   :  { %541 = vsyncpa [#allocation9], 1 }

</bundles_post_ra>
